<compile_context>
chip_gen: v5e
topology: v5e:2x2
jax: 0.10.0
libtpu: 0.0.40
codegen_flags: <defaults>
</compile_context>

<pallas_src>
import functools

import jax
import jax.numpy as jnp
from jax.experimental import pallas as pl
from jax.experimental.pallas import tpu as pltpu

ALPHA = 0.25
GAMMA = 5

_LANES = 128
_SUBLANES = 8
# Row granularity that satisfies TPU tiling for f32 (8) and bf16 (16) blocks.
_ROW_ALIGN = 32


def _focal_loss_kernel(x_ref, t_ref, o_ref, *, alpha, gamma, total_n,
                       block_rows, has_tail):
    """One grid step: focal loss for a (block_rows, 128) tile, folded onto a
    lane/sublane-dense (8, 128) partial sum written to this block's out slot."""
    x = x_ref[...].astype(jnp.float32)
    t = t_ref[...].astype(jnp.float32)

    # Numerically stable BCE-with-logits (torch formulation):
    #   bce = max(x, 0) - x*t + log1p(exp(-|x|))
    e = jnp.exp(-jnp.abs(x))                                   # EUP (reused below)
    bce = jnp.maximum(x, 0.0) - x * t + jnp.log1p(e)

    # pt = exp(-bce).  For binary targets this is exactly
    #   pt = 1/(1+e)   when sign(x) "agrees" with t,   e/(1+e) otherwise,
    # which reuses `e` and saves one EUP exp per element.
    inv = 1.0 / (1.0 + e)
    pt = jnp.where((x >= 0.0) == (t >= 0.5), inv, e * inv)

    # at = alpha_table[t] with alpha_table = [alpha, 1-alpha]; single FMA for 0/1 t.
    at = alpha + (1.0 - 2.0 * alpha) * t

    # gamma is a Python int -> integer_pow (3 VPU multiplies), not exp/log.
    f_loss = at * (1.0 - pt) ** gamma * bce

    if has_tail:
        # Mask out zero-padded tail elements so the mean over N stays exact.
        i = pl.program_id(0)
        row_ids = jax.lax.broadcasted_iota(jnp.int32, (block_rows, _LANES), 0)
        lane_ids = jax.lax.broadcasted_iota(jnp.int32, (block_rows, _LANES), 1)
        gidx = (i * block_rows + row_ids) * _LANES + lane_ids
        f_loss = jnp.where(gidx < total_n, f_loss, 0.0)

    # Vreg-shaped partial sum: fold the block onto (8, 128) with pure VALU adds
    # (no per-step cross-lane XLU reduce; lane-dense output write).
    partial = f_loss.reshape(block_rows // _SUBLANES, _SUBLANES, _LANES).sum(axis=0)
    o_ref[...] = partial


def weighted_focal_loss(inputs, targets, *, alpha=ALPHA, gamma=GAMMA,
                        max_block_rows=2048):
    """Mean binary focal loss with alpha weighting.

    inputs:  logits, any shape.
    targets: same shape, values in {0, 1} (as required by the PyTorch gather).
    """
    assert inputs.shape == targets.shape
    x = inputs.reshape(-1)
    t = targets.reshape(-1)
    n = x.shape[0]

    rows = pl.cdiv(n, _LANES)
    rows_aligned = ((rows + _ROW_ALIGN - 1) // _ROW_ALIGN) * _ROW_ALIGN
    block_rows = min(int(max_block_rows), rows_aligned)
    block_rows = ((block_rows + _ROW_ALIGN - 1) // _ROW_ALIGN) * _ROW_ALIGN
    padded_rows = ((rows_aligned + block_rows - 1) // block_rows) * block_rows
    padded_n = padded_rows * _LANES
    has_tail = padded_n != n

    if has_tail:
        x = jnp.pad(x, (0, padded_n - n))
        t = jnp.pad(t, (0, padded_n - n))

    x2 = x.reshape(padded_rows, _LANES).astype(jnp.float32)
    # Targets are exactly 0/1 -> bf16 is lossless and halves their HBM traffic.
    t2 = t.reshape(padded_rows, _LANES).astype(jnp.bfloat16)

    num_blocks = padded_rows // block_rows

    kernel = functools.partial(
        _focal_loss_kernel, alpha=float(alpha), gamma=int(gamma), total_n=n,
        block_rows=block_rows, has_tail=has_tail)

    partials = pl.pallas_call(
        kernel,
        out_shape=jax.ShapeDtypeStruct((num_blocks, _SUBLANES, _LANES),
                                       jnp.float32),
        grid_spec=pltpu.PrefetchScalarGridSpec(
            num_scalar_prefetch=0,
            grid=(num_blocks,),
            in_specs=[
                pl.BlockSpec((block_rows, _LANES), lambda i: (i, 0)),
                pl.BlockSpec((block_rows, _LANES), lambda i: (i, 0)),
            ],
            out_specs=pl.BlockSpec((None, _SUBLANES, _LANES),
                                   lambda i: (i, 0, 0)),
        ),
        compiler_params=pltpu.CompilerParams(
            dimension_semantics=("parallel",)),
    )(x2, t2)

    # Tiny cross-block / cross-lane reduction + mean outside the kernel.
    return jnp.sum(partials) / jnp.float32(n)


def _reference(inputs, targets, alpha=ALPHA, gamma=GAMMA):
    x = inputs.reshape(-1).astype(jnp.float32)
    t = targets.reshape(-1).astype(jnp.float32)
    bce = jnp.maximum(x, 0.0) - x * t + jnp.log1p(jnp.exp(-jnp.abs(x)))
    at = jnp.where(t.astype(jnp.int32) == 0, alpha, 1.0 - alpha)
    pt = jnp.exp(-bce)
    return jnp.mean(at * (1.0 - pt) ** gamma * bce)


if __name__ == "__main__":
    key = jax.random.PRNGKey(0)

    # Small shapes consistent with the module (arbitrary logit tensors + binary
    # targets). The ragged (1000,) case exercises the tail-masking path.
    shapes = [(2, 4, 16, 16), (1000,)]
    for idx, shp in enumerate(shapes):
        k1, k2 = jax.random.split(jax.random.fold_in(key, idx))
        inputs = jax.random.normal(k1, shp, dtype=jnp.float32) * 2.0
        targets = jax.random.bernoulli(k2, p=0.3, shape=shp).astype(jnp.float32)
        loss = jax.block_until_ready(weighted_focal_loss(inputs, targets))
        ref = _reference(inputs, targets)
        assert jnp.allclose(loss, ref, rtol=5e-5, atol=1e-6), (shp, loss, ref)

    # Multi-block grid (exercises the per-block "parallel" partial-sum path).
    k1, k2 = jax.random.split(jax.random.fold_in(key, 99))
    shp = (32768,)
    inputs = jax.random.normal(k1, shp, dtype=jnp.float32) * 2.0
    targets = jax.random.bernoulli(k2, p=0.3, shape=shp).astype(jnp.float32)
    loss = jax.block_until_ready(
        weighted_focal_loss(inputs, targets, max_block_rows=64))
    ref = _reference(inputs, targets)
    assert jnp.allclose(loss, ref, rtol=5e-5, atol=1e-6), (loss, ref)

    print("KERNEL_OK")
</pallas_src>

<mosaic_0001>
module attributes {stable_mosaic.version = 11 : i64} {
  func.func @_focal_loss_kernel(%arg0: i32, %arg1: memref<32x128xf32, #tpu.memory_space<vmem>>, %arg2: memref<32x128xbf16, #tpu.memory_space<vmem>>, %arg3: memref<1x8x128xf32, #tpu.memory_space<vmem>>) attributes {dimension_semantics = [#tpu.dimension_semantics<parallel>], iteration_bounds = array<i64: 1>, scalar_prefetch = 0 : i64, scratch_operands = 0 : i64, tpu.core_type = #tpu.core_type<tc>, window_params = [{transform_indices = @transform_0, window_bounds = array<i64: 32, 128>}, {transform_indices = @transform_1, window_bounds = array<i64: 32, 128>}, {transform_indices = @transform_2, window_bounds = array<i64: 1, 8, 128>}]} {
    %c0 = arith.constant 0 : index
    %c0_0 = arith.constant 0 : index
    %0 = vector.load %arg1[%c0, %c0_0] : memref<32x128xf32, #tpu.memory_space<vmem>>, vector<32x128xf32>
    %c0_1 = arith.constant 0 : index
    %c0_2 = arith.constant 0 : index
    %1 = vector.load %arg2[%c0_1, %c0_2] : memref<32x128xbf16, #tpu.memory_space<vmem>>, vector<32x128xbf16>
    %2 = arith.extf %1 : vector<32x128xbf16> to vector<32x128xf32>
    %3 = math.absf %0 : vector<32x128xf32>
    %cst = arith.constant 0.000000e+00 : f32
    %4 = vector.broadcast %cst : f32 to vector<32x128xf32>
    %5 = arith.subf %4, %3 : vector<32x128xf32>
    %6 = math.exp %5 : vector<32x128xf32>
    %cst_3 = arith.constant 0.000000e+00 : f32
    %7 = vector.broadcast %cst_3 : f32 to vector<32x128xf32>
    %8 = arith.maximumf %0, %7 : vector<32x128xf32>
    %9 = arith.mulf %0, %2 : vector<32x128xf32>
    %10 = arith.subf %8, %9 : vector<32x128xf32>
    %11 = math.log1p %6 : vector<32x128xf32>
    %12 = arith.addf %10, %11 : vector<32x128xf32>
    %cst_4 = arith.constant 1.000000e+00 : f32
    %13 = vector.broadcast %cst_4 : f32 to vector<32x128xf32>
    %14 = arith.addf %13, %6 : vector<32x128xf32>
    %cst_5 = arith.constant 1.000000e+00 : f32
    %15 = vector.broadcast %cst_5 : f32 to vector<32x128xf32>
    %16 = arith.divf %15, %14 : vector<32x128xf32>
    %cst_6 = arith.constant 0.000000e+00 : f32
    %17 = vector.broadcast %cst_6 : f32 to vector<32x128xf32>
    %18 = arith.cmpf oge, %0, %17 : vector<32x128xf32>
    %cst_7 = arith.constant 5.000000e-01 : f32
    %19 = vector.broadcast %cst_7 : f32 to vector<32x128xf32>
    %20 = arith.cmpf oge, %2, %19 : vector<32x128xf32>
    %21 = arith.xori %18, %20 : vector<32x128xi1>
    %cst_8 = arith.constant dense<true> : vector<32x128xi1>
    %22 = arith.xori %21, %cst_8 : vector<32x128xi1>
    %23 = arith.mulf %6, %16 : vector<32x128xf32>
    %24 = arith.select %22, %16, %23 : vector<32x128xi1>, vector<32x128xf32>
    %cst_9 = arith.constant 5.000000e-01 : f32
    %25 = vector.broadcast %cst_9 : f32 to vector<32x128xf32>
    %26 = arith.mulf %25, %2 : vector<32x128xf32>
    %cst_10 = arith.constant 2.500000e-01 : f32
    %27 = vector.broadcast %cst_10 : f32 to vector<32x128xf32>
    %28 = arith.addf %27, %26 : vector<32x128xf32>
    %cst_11 = arith.constant 1.000000e+00 : f32
    %29 = vector.broadcast %cst_11 : f32 to vector<32x128xf32>
    %30 = arith.subf %29, %24 : vector<32x128xf32>
    %31 = arith.mulf %30, %30 : vector<32x128xf32>
    %32 = arith.mulf %31, %31 : vector<32x128xf32>
    %33 = arith.mulf %30, %32 : vector<32x128xf32>
    %34 = arith.mulf %28, %33 : vector<32x128xf32>
    %35 = arith.mulf %34, %12 : vector<32x128xf32>
    %36 = tpu.iota {dimensions = array<i32: 0>} : vector<32x128xi32>
    %37 = tpu.iota {dimensions = array<i32: 1>} : vector<32x128xi32>
    %c32_i32 = arith.constant 32 : i32
    %38 = arith.muli %arg0, %c32_i32 : i32
    %39 = vector.broadcast %38 : i32 to vector<32x128xi32>
    %40 = arith.addi %39, %36 : vector<32x128xi32>
    %c128_i32 = arith.constant 128 : i32
    %41 = vector.broadcast %c128_i32 : i32 to vector<32x128xi32>
    %42 = arith.muli %40, %41 : vector<32x128xi32>
    %43 = arith.addi %42, %37 : vector<32x128xi32>
    %c2048_i32 = arith.constant 2048 : i32
    %44 = vector.broadcast %c2048_i32 : i32 to vector<32x128xi32>
    %45 = arith.cmpi slt, %43, %44 : vector<32x128xi32>
    %cst_12 = arith.constant 0.000000e+00 : f32
    %46 = vector.broadcast %cst_12 : f32 to vector<32x128xf32>
    %47 = arith.select %45, %35, %46 : vector<32x128xi1>, vector<32x128xf32>
    %48 = vector.shape_cast %47 : vector<32x128xf32> to vector<4x8x128xf32>
    %cst_13 = arith.constant dense<0.000000e+00> : vector<8x128xf32>
    %49 = vector.multi_reduction <add>, %48, %cst_13 [0] : vector<4x8x128xf32> to vector<8x128xf32>
    %c0_14 = arith.constant 0 : index
    %c0_15 = arith.constant 0 : index
    %c0_16 = arith.constant 0 : index
    %50 = vector.load %arg3[%c0_14, %c0_15, %c0_16] : memref<1x8x128xf32, #tpu.memory_space<vmem>>, vector<1x8x128xf32>
    %51 = vector.shape_cast %50 : vector<1x8x128xf32> to vector<8x128xf32>
    %52 = vector.shape_cast %49 : vector<8x128xf32> to vector<1x8x128xf32>
    tpu.vector_store %arg3[%c0_14, %c0_15, %c0_16], %52 {strides = array<i32>} : memref<1x8x128xf32, #tpu.memory_space<vmem>>, vector<1x8x128xf32>,
    return
  }
  func.func @transform_0(%arg0: i32) -> (i32, i32) {
    %c0_i32 = arith.constant 0 : i32
    %c0_i32_0 = arith.constant 0 : i32
    return %arg0, %c0_i32 : i32, i32
  }
  func.func @transform_1(%arg0: i32) -> (i32, i32) {
    %c0_i32 = arith.constant 0 : i32
    %c0_i32_0 = arith.constant 0 : i32
    return %arg0, %c0_i32 : i32, i32
  }
  func.func @transform_2(%arg0: i32) -> (i32, i32, i32) {
    %c0_i32 = arith.constant 0 : i32
    %c0_i32_0 = arith.constant 0 : i32
    %c0_i32_1 = arith.constant 0 : i32
    return %arg0, %c0_i32, %c0_i32_0 : i32, i32, i32
  }
}

</mosaic_0001>

<bundles_post_ra>
// kernel: tpu_custom_call.1
= control target key start
LH: loop header
LB: loop body
LE: loop exit
PB: predicated region body
PF: predicated region fallthrough
CT: control target
= control target key end

     0   :  { %7 = vsyncpa [#allocation3], 0  ;;  %s740_s0 = inlined_call_operand.hbm [shape: f32[32,128], index: 0, kind: input, shape index: {}]   ;;  %s741_s1 = inlined_call_operand.hbm [shape: bf16[32,128], index: 1, kind: input, shape index: {}]   ;;  %s742_s2 = inlined_call_operand.hbm [shape: f32[1,8,128], index: 2, kind: output, shape index: {}]  }
   0x1   :  { %8 = vsyncpa [#allocation6], 0 }
   0x2   :  { %9 = vsyncpa [#allocation4], 0  ;;  %s14_s11 = sshll.u32 %s740_s0, 4  ;;  %s414_s12 = smov [#allocation2]   ;;  %s15_s11 = int_to_ptr.hbm [resolvable:$true] %s14_s11 }
   0x3   :  { %s16_s13 = sshll.u32 %s414_s12, 4  ;;  %s27_s16 = sshll.u32 %s741_s1, 4  ;;  %s17_s13 = int_to_ptr.vmem [resolvable:$true] %s16_s13  ;;  %s28_s16 = int_to_ptr.hbm [resolvable:$true] %s27_s16 }
   0x4   :  { %s415_s17 = smov 128   ;;  %s416_s18 = smov 8  }
   0x5   :  { %22 = dma.hbm_to_vmem [thread:$0]  %s15_s11, 512, %s17_s13, [#allocation3], %s415_s17, %s415_s17, %s416_s18  }
   0x6   :  { %s417_s19 = smov [#allocation5]   ;;  %s418_s21 = smov 64  }
   0x7   :  { %s29_s20 = sshll.u32 %s417_s19, 4  ;;  %s419_s22 = smov 4   ;;  %s30_s20 = int_to_ptr.vmem [resolvable:$true] %s29_s20 }
   0x8   :  { %35 = dma.hbm_to_vmem [thread:$0]  %s28_s16, 256, %s30_s20, [#allocation6], %s418_s21, %s418_s21, %s419_s22  }
   0x9   :  { %408 = dma.done.wait [#allocation3], 512  }
   0xa   :  { %409 = vsyncadd [#allocation3], 4294966784 }
   0xb   :  { %410 = dma.done.wait [#allocation6], 256  }
   0xc   :  { %411 = vsyncadd [#allocation6], 4294967040  ;;  %v443_v0 = vld [vmem:[#allocation2] sm:$0xff]  ;;  %v445_v1 = vld [vmem:[#allocation2 + $0x8] sm:$0xff]  ;;  %v244_v49 = vlaneseq  ;;  %s421_s0 = smov [#allocation7]   ;;  %s284_s25 = sshll.u32 %s742_s2, 4  ;;  %s285_s25 = int_to_ptr.hbm [resolvable:$true] %s284_s25 }
   0xd   :  { %v447_v2 = vld [vmem:[#allocation2 + $0x10] sm:$0xff]  ;;  %v449_v3 = vld [vmem:[#allocation2 + $0x18] sm:$0xff]  ;;  %v56_v4 = vand.u32 2147483647, %v443_v0  ;;  %v57_v5 = vand.u32 2147483647, %v445_v1 }
   0xe   :  { %v58_v6 = vand.u32 2147483647, %v447_v2  ;;  %v59_v7 = vand.u32 2147483647, %v449_v3  ;;  %v296_v15 = vld [vmem:[#allocation5] sm:$0xff]   ;;  %v303_v17 = vld [vmem:[#allocation5 + $0x8] sm:$0xff]  }
   0xf   :  { %v60_v8 = vsub.f32 0.0, %v56_v4  ;;  %v61_v9 = vsub.f32 0.0, %v57_v5  ;;  %v455_v18 = vunpack.c.l.bf16 %v296_v15  ;;  %v457_v19 = vunpack.c.h.bf16 %v296_v15  ;;  %s282_s1 = sshll.u32 %s421_s0, 4  ;;  %s283_s1 = int_to_ptr.vmem [resolvable:$true] %s282_s1 }
  0x10   :  { %v62_v10 = vsub.f32 0.0, %v58_v6  ;;  %v63_v11 = vsub.f32 0.0, %v59_v7  ;;  %v72_v20 = vmax.f32 %v443_v0, 0.0  ;;  %v460_v21 = vunpack.c.l.bf16 %v303_v17 }
  0x11   :  { %v64_v12 = vmul.f32 1.442695, %v60_v8  ;;  %v66_v13 = vmul.f32 1.442695, %v61_v9  ;;  %v462_v22 = vunpack.c.h.bf16 %v303_v17  ;;  %v76_v23 = vmul.f32 %v455_v18, %v443_v0 }
  0x12   :  { %v68_v14 = vmul.f32 1.442695, %v62_v10  ;;  %v70_v16 = vmul.f32 1.442695, %v63_v11  ;;  %v73_v25 = vmax.f32 %v445_v1, 0.0  ;;  %v74_v26 = vmax.f32 %v447_v2, 0.0 }
  0x13   :  { %312 = vpow2.f32 %v64_v12  ;;  %v77_v27 = vmul.f32 %v457_v19, %v445_v1  ;;  %v75_v29 = vmax.f32 %v449_v3, 0.0  ;;  %v78_v30 = vmul.f32 %v460_v21, %v447_v2 }
  0x14   :  { %314 = vpow2.f32 %v66_v13  ;;  %v79_v31 = vmul.f32 %v462_v22, %v449_v3  ;;  %v487_v35 = vsub.f32 %v72_v20, %v76_v23  ;;  %vm188_vm0 = vcmp.ge.f32.partialorder %v443_v0, 0.0 }
  0x15   :  { %316 = vpow2.f32 %v68_v14  ;;  %v491_v37 = vsub.f32 %v73_v25, %v77_v27  ;;  %v500_v41 = vsub.f32 %v74_v26, %v78_v30  ;;  %vm192_vm1 = vcmp.ge.f32.partialorder %v455_v18, 0.5 }
  0x16   :  { %318 = vpow2.f32 %v70_v16  ;;  %v502_v42 = vsub.f32 %v75_v29, %v79_v31  ;;  %vm189_vm2 = vcmp.ge.f32.partialorder %v445_v1, 0.0  ;;  %vm193_vm3 = vcmp.ge.f32.partialorder %v457_v19, 0.5  ;;  %vm581_vm8 = vmxor %vm188_vm0, %vm192_vm1 }
  0x17   :  { %v514_v48 = vmul.f32 0.5, %v455_v18  ;;  %vm190_vm4 = vcmp.ge.f32.partialorder %v447_v2, 0.0  ;;  %vm194_vm5 = vcmp.ge.f32.partialorder %v460_v21, 0.5  ;;  %v523_v52 = vmul.f32 0.5, %v457_v19 }
  0x18   :  { %vm195_vm9 = vcmp.ge.f32.partialorder %v462_v22, 0.5  ;;  %vm608_vm0 = vmxor %vm190_vm4, %vm194_vm5  ;;  %vm763_vm5 = vcmp.ge.f32.partialorder %v449_v3, 0.0 }
  0x19   :  { %v466_v24 = vpop.eup %312  ;;  %v217_v2 = vadd.f32 0.25, %v523_v52 }
  0x1a   :  { %v472_v28 = vpop.eup %314  ;;  %v480_v32 = vadd.f32 1.0, %v466_v24  ;;  %v87_v36 = vmul.f32 -0.5, %v466_v24  ;;  %v90_v43 = vand.u32 2147483647, %v466_v24 }
  0x1b   :  { %v482_v33 = vpop.eup %316  ;;  %v485_v34 = vadd.f32 1.0, %v472_v28  ;;  %v96_v38 = vmul.f32 -0.5, %v472_v28  ;;  %v99_v45 = vand.u32 2147483647, %v472_v28 }
  0x1c   :  { %320 = vlog2.f32 %v480_v32  ;;  %v496_v39 = vadd.f32 1.0, %v482_v33  ;;  %v498_v40 = vpop.eup %318  ;;  %v105_v44 = vmul.f32 -0.5, %v482_v33  ;;  %v88_v47 = vadd.f32 1.0, %v87_v36 }
  0x1d   :  { %322 = vlog2.f32 %v485_v34  ;;  %v114_v46 = vmul.f32 -0.5, %v498_v40  ;;  %v97_v50 = vadd.f32 1.0, %v96_v38  ;;  %v517_v51 = vadd.f32 1.0, %v498_v40 }
  0x1e   :  { %324 = vlog2.f32 %v496_v39  ;;  %vm525_vm6 = vcmp.lt.f32.partialorder %v90_v43, 0.0004427343  ;;  %v106_v55 = vadd.f32 1.0, %v105_v44  ;;  %v108_v56 = vand.u32 2147483647, %v482_v33 }
  0x1f   :  { %326 = vrcp.f32 %v480_v32  ;;  %vm531_vm7 = vcmp.lt.f32.partialorder %v99_v45, 0.0004427343  ;;  %v115_v59 = vadd.f32 1.0, %v114_v46  ;;  %v137_v60 = vand.u32 2147483647, %v480_v32 }
  0x20   :  { %328 = vrcp.f32 %v485_v34  ;;  %v89_v62 = vmul.f32 %v466_v24, %v88_v47  ;;  %v139_v63 = vand.u32 2147483648, %v480_v32  ;;  %v98_v5 = vmul.f32 %v472_v28, %v97_v50 }
  0x21   :  { %330 = vlog2.f32 %v517_v51  ;;  %v117_v6 = vand.u32 2147483647, %v498_v40  ;;  %v152_v7 = vand.u32 2147483647, %v485_v34  ;;  %v154_v8 = vand.u32 2147483648, %v485_v34 }
  0x22   :  { %v321_v53 = vpop.eup %320  ;;  %332 = vrcp.f32 %v496_v39  ;;  %v547_v10 = vmul.f32 %v482_v33, %v106_v55  ;;  %vm549_vm10 = vcmp.lt.f32.partialorder %v108_v56, 0.0004427343  ;;  %vm133_vm11 = vweird.f32 %v480_v32 }
  0x23   :  { %v323_v57 = vpop.eup %322  ;;  %v86_v61 = vmul.f32 0.6931472, %v321_v53  ;;  %v555_v13 = vmul.f32 %v498_v40, %v115_v59  ;;  %vm557_vm12 = vcmp.eq.f32.partialorder %v137_v60, 8.507059e+37  ;;  %vm148_vm13 = vweird.f32 %v485_v34 }
  0x24   :  { %v325_v4 = vpop.eup %324  ;;  %v95_v9 = vmul.f32 0.6931472, %v323_v57  ;;  %334 = vrcp.f32 %v517_v51  ;;  %v140_v23 = vor.u32 1.1754944e-38, %v139_v63  ;;  %vm569_vm14 = vcmp.eq.f32.partialorder %v152_v7, 8.507059e+37 }
  0x25   :  { %v327_v12 = vpop.eup %326  ;;  %v92_v16 = vsel %vm525_vm6, %v89_v62, %v86_v61  ;;  %v565_v17 = vmul.f32 0.6931472, %v325_v4  ;;  %v155_v29 = vor.u32 1.1754944e-38, %v154_v8  ;;  %v169_v38 = vand.u32 2147483648, %v496_v39 }
  0x26   :  { %v329_v15 = vpop.eup %328  ;;  %v129_v20 = vmul.f32 %v327_v12, %v480_v32  ;;  %v101_v31 = vsel %vm531_vm7, %v98_v5, %v95_v9  ;;  %vm134_vm6 = vweird.f32 %v327_v12  ;;  %v586_v44 = vadd.f32 %v92_v16, %v487_v35  ;;  %vm593_vm7 = vmxor %vm189_vm2, %vm193_vm3 }
  0x27   :  { %v331_v25 = vpop.eup %330  ;;  %v144_v26 = vmul.f32 %v329_v15, %v485_v34  ;;  %vm149_vm15 = vweird.f32 %v329_v15  ;;  %v110_v0 = vsel %vm549_vm10, %v547_v10, %v565_v17  ;;  %v167_v50 = vand.u32 2147483647, %v496_v39  ;;  %vm618_vm1 = vmor %vm133_vm11, %vm134_vm6 }
  0x28   :  { %v333_v30 = vpop.eup %332  ;;  %v130_v36 = vsub.f32 1.0, %v129_v20  ;;  %v601_v18 = vmul.f32 0.6931472, %v331_v25  ;;  %v613_v53 = vadd.f32 %v101_v31, %v491_v37  ;;  %vm625_vm3 = vmor %vm148_vm13, %vm149_vm15  ;;  %v170_v37 = vor.u32 1.1754944e-38, %v169_v38 }
  0x29   :  { %v145_v45 = vsub.f32 1.0, %v144_v26  ;;  %v159_v46 = vmul.f32 %v333_v30, %v496_v39  ;;  %vm164_vm2 = vweird.f32 %v333_v30  ;;  %v182_v32 = vand.u32 2147483647, %v517_v51  ;;  %vm637_vm11 = vmxor %vm763_vm5, %vm195_vm9 }
  0x2a   :  { %v131_v35 = vmul.f32 %v327_v12, %v130_v36  ;;  %v335_v19 = vpop.eup %334  ;;  %vm178_vm4 = vweird.f32 %v517_v51  ;;  %v184_v61 = vand.u32 2147483648, %v517_v51  ;;  %vm766_vm13 = vweird.f32 %v496_v39 }
  0x2b   :  { %v146_v55 = vmul.f32 %v329_v15, %v145_v45  ;;  %v160_v56 = vsub.f32 1.0, %v159_v46  ;;  %v174_v58 = vmul.f32 %v335_v19, %v517_v51  ;;  %vm645_vm15 = vmor %vm766_vm13, %vm164_vm2  ;;  %vm179_vm6 = vweird.f32 %v335_v19 }
  0x2c   :  { %v132_v57 = vadd.f32 %v327_v12, %v131_v35  ;;  %v245_v5 = vshrl.u32 %v244_v49, 7  ;;  %vm168_vm9 = vcmp.eq.f32.partialorder %v167_v50, 8.507059e+37  ;;  %vm420_vm5 = vmmov 1  }
  0x2d   :  { %v147_v59 = vadd.f32 %v329_v15, %v146_v55  ;;  %v161_v60 = vmul.f32 %v333_v30, %v160_v56  ;;  %v175_v4 = vsub.f32 1.0, %v174_v58  ;;  %vm663_vm2 = vcmp.eq.f32.partialorder %v182_v32, 8.507059e+37 }
  0x2e   :  { %v136_v62 = vsel %vm618_vm1, %v327_v12, %v132_v57  ;;  %vm657_vm1 = vmxor %vm581_vm8, %vm420_vm5  ;;  %vm677_vm8 = vcmp.lt.f32.partialorder %v117_v6, 0.0004427343  ;;  %v185_v26 = vor.u32 1.1754944e-38, %v184_v61  ;;  %v247_v43 = vadd.s32 16, %v245_v5 }
  0x2f   :  { %v141_v3 = vsel %vm557_vm12, %v140_v23, %v136_v62  ;;  %v151_v7 = vsel %vm625_vm3, %v329_v15, %v147_v59  ;;  %v162_v8 = vadd.f32 %v333_v30, %v161_v60  ;;  %v176_v12 = vmul.f32 %v335_v19, %v175_v4  ;;  %vm670_vm12 = vmxor %vm593_vm7, %vm420_vm5 }
  0x30   :  { %v156_v9 = vsel %vm569_vm14, %v155_v29, %v151_v7  ;;  %v204_v16 = vmul.f32 %v466_v24, %v141_v3  ;;  %vm686_vm14 = vmor %vm178_vm4, %vm179_vm6  ;;  %v246_v24 = vadd.s32 8, %v245_v5  ;;  %v250_v47 = vand.u32 127, %v244_v49 }
  0x31   :  { %v166_v23 = vsel %vm645_vm15, %v333_v30, %v162_v8  ;;  %v205_v27 = vmul.f32 %v472_v28, %v156_v9  ;;  %v177_v31 = vadd.f32 %v335_v19, %v176_v12  ;;  %vm694_vm7 = vmxor %vm608_vm0, %vm420_vm5  ;;  %v214_v30 = vmul.f32 0.5, %v460_v21 }
  0x32   :  { %v171_v29 = vsel %vm168_vm9, %v170_v37, %v166_v23  ;;  %v208_v51 = vsel %vm657_vm1, %v141_v3, %v204_v16  ;;  %v257_v35 = vmul.u32 128, %v245_v5  ;;  %vm712_vm0 = vmxor %vm637_vm11, %vm420_vm5  ;;  %v258_v54 = vmul.u32 128, %v246_v24 }
  0x33   :  { %v206_v36 = vmul.f32 %v482_v33, %v171_v29  ;;  %v209_v28 = vsel %vm670_vm12, %v156_v9, %v205_v27  ;;  %v220_v38 = vsub.f32 1.0, %v208_v51  ;;  %v181_v45 = vsel %vm686_vm14, %v335_v19, %v177_v31 }
  0x34   :  { %v221_v46 = vsub.f32 1.0, %v209_v28  ;;  %v186_v50 = vsel %vm663_vm2, %v185_v26, %v181_v45  ;;  %v248_v56 = vadd.s32 24, %v245_v5  ;;  %v216_v57 = vadd.f32 0.25, %v514_v48 }
  0x35   :  { %v210_v33 = vsel %vm694_vm7, %v171_v29, %v206_v36  ;;  %v224_v1 = vmul.f32 %v220_v38, %v220_v38  ;;  %v207_v19 = vmul.f32 %v498_v40, %v186_v50  ;;  %v259_v58 = vmul.u32 128, %v247_v43 }
  0x36   :  { %v222_v55 = vsub.f32 1.0, %v210_v33  ;;  %v225_v49 = vmul.f32 %v221_v46, %v221_v46  ;;  %v261_v61 = vadd.s32 %v257_v35, %v250_v47  ;;  %v215_v34 = vmul.f32 0.5, %v462_v22 }
  0x37   :  { %v228_v37 = vmul.f32 %v224_v1, %v224_v1  ;;  %v211_v32 = vsel %vm712_vm0, %v186_v50, %v207_v19  ;;  %v262_v40 = vadd.s32 %v258_v54, %v250_v47  ;;  %v218_v4 = vadd.f32 0.25, %v214_v30 }
  0x38   :  { %v226_v59 = vmul.f32 %v222_v55, %v222_v55  ;;  %v229_v60 = vmul.f32 %v225_v49, %v225_v49  ;;  %v223_v62 = vsub.f32 1.0, %v211_v32  ;;  %v260_v7 = vmul.u32 128, %v248_v56 }
  0x39   :  { %v232_v63 = vmul.f32 %v228_v37, %v220_v38  ;;  %v122_v48 = vadd.f32 %v110_v0, %v500_v41  ;;  %v263_v39 = vadd.s32 %v259_v58, %v250_v47  ;;  %v119_v22 = vsel %vm677_vm8, %v555_v13, %v601_v18 }
  0x3a   :  { %v230_v3 = vmul.f32 %v226_v59, %v226_v59  ;;  %v233_v5 = vmul.f32 %v229_v60, %v221_v46  ;;  %v227_v52 = vmul.f32 %v223_v62, %v223_v62  ;;  %vm265_vm3 = vcmp.lt.s32.totalorder %v261_v61, 2048 }
  0x3b   :  { %v236_v8 = vmul.f32 %v232_v63, %v216_v57  ;;  %v219_v14 = vadd.f32 0.25, %v215_v34  ;;  %vm266_vm4 = vcmp.lt.s32.totalorder %v262_v40, 2048  ;;  %v264_v41 = vadd.s32 %v260_v7, %v250_v47 }
  0x3c   :  { %v234_v9 = vmul.f32 %v230_v3, %v222_v55  ;;  %v237_v12 = vmul.f32 %v233_v5, %v217_v2  ;;  %v231_v15 = vmul.f32 %v227_v52, %v227_v52  ;;  %v123_v17 = vadd.f32 %v119_v22, %v502_v42 }
  0x3d   :  { %v240_v16 = vmul.f32 %v236_v8, %v586_v44  ;;  %vm267_vm10 = vcmp.lt.s32.totalorder %v263_v39, 2048  ;;  %vm268_vm11 = vcmp.lt.s32.totalorder %v264_v41, 2048 }
  0x3e   :  { %v238_v11 = vmul.f32 %v234_v9, %v218_v4  ;;  %v241_v10 = vmul.f32 %v237_v12, %v613_v53  ;;  %v235_v0 = vmul.f32 %v231_v15, %v223_v62 }
  0x3f   :  { %v269_v23 = vsel %vm265_vm3, %v240_v16, 0.0 }
  0x40   :  { %v242_v25 = vmul.f32 %v238_v11, %v122_v48  ;;  %v270_v20 = vsel %vm266_vm4, %v241_v10, 0.0  ;;  %v239_v13 = vmul.f32 %v235_v0, %v219_v14 }
  0x41   :  { %v273_v18 = vadd.f32 %v270_v20, %v269_v23 }
  0x42   :  { %v271_v26 = vsel %vm267_vm10, %v242_v25, 0.0  ;;  %v243_v27 = vmul.f32 %v239_v13, %v123_v17 }
  0x43   :  { %v274_v24 = vadd.f32 %v273_v18, %v271_v26 }
  0x44   :  { %v272_v44 = vsel %vm268_vm11, %v243_v27, 0.0 }
  0x45   :  { %v275_v53 = vadd.f32 %v274_v24, %v272_v44 }
  0x47   :  { %276 = vst [vmem:[#allocation7] sm:$0xff] %v275_v53 }
  0x48   :  { %287 = dma.vmem_to_hbm [thread:$0]  %s283_s1, 128, %s285_s25, [#allocation4]  }
  0x49   :  { %412 = dma.done.wait [#allocation4], 128  }
  0x4a   :  { %413 = vsyncadd [#allocation4], 4294967168 }
  0x4b   :  { %292 = vsyncpa [#allocation3], 1 }
  0x4c   :  { %293 = vsyncpa [#allocation6], 1 }
  0x4d   :  { %294 = vsyncpa [#allocation4], 1 }

</bundles_post_ra>
